<compile_context>
chip_gen: v5e
topology: v5e:2x2
jax: 0.10.0
libtpu: 0.0.40
codegen_flags: <defaults>
</compile_context>

<pallas_src>
import functools
import math

import jax
import jax.numpy as jnp
from jax.experimental import pallas as pl
from jax.experimental.pallas import tpu as pltpu


def _ctrlb_fused_kernel(u_ref, x_ref, out_ref, mask_ref, *, k):
    """Fused pool + prob + bottom->top scatter + Bernoulli mask + apply.

    u_ref:    (Nb, 1, C)  uniform [0,1) draws (f32)
    x_ref:    (Nb, C, HW) input features
    out_ref:  (Nb, C, HW) x * per-channel drop mask
    mask_ref: (Nb, 1, C)  per-channel drop mask in {0, 1} (f32)
    """
    x = x_ref[...]
    # Global average pool over the flattened spatial dim (f32 accumulation).
    pooled = jnp.mean(x.astype(jnp.float32), axis=2)              # (Nb, C)
    ordered = jnp.abs(pooled)                                     # == sqrt(pooled**2)
    prob = ordered / jnp.max(ordered, axis=1, keepdims=True)      # in [0, 1]

    if k > 0:
        c = prob.shape[1]
        col = jax.lax.broadcasted_iota(jnp.int32, prob.shape, 1)

        def body(_, carry):
            new_prob, work_top, work_btm = carry
            # next-largest position of the original prob (ties -> lowest index)
            cur_max = jnp.max(work_top, axis=1, keepdims=True)
            idx_max = jnp.min(jnp.where(work_top == cur_max, col, c),
                              axis=1, keepdims=True)
            sel_max = col == idx_max
            # next-smallest value of the original prob
            cur_min = jnp.min(work_btm, axis=1, keepdims=True)
            idx_min = jnp.min(jnp.where(work_btm == cur_min, col, c),
                              axis=1, keepdims=True)
            sel_min = col == idx_min
            # scatter the bottom value onto the top index
            new_prob = jnp.where(sel_max, cur_min, new_prob)
            work_top = jnp.where(sel_max, -jnp.inf, work_top)
            work_btm = jnp.where(sel_min, jnp.inf, work_btm)
            return new_prob, work_top, work_btm

        # NOTE: pairing is sorted-top <-> sorted-bottom; torch.topk(sorted=False)
        # leaves the pairing unspecified — the scattered multiset is identical.
        prob, _, _ = jax.lax.fori_loop(0, k, body, (prob, prob, prob),
                                       unroll=(k <= 8))

    prob = jnp.clip(prob, 0.0, 1.0)

    # drop mask = bernoulli(1 - prob): keep a channel with probability (1 - prob).
    u = u_ref[...][:, 0, :]                                       # (Nb, C)
    keep = (u < (jnp.float32(1.0) - prob)).astype(jnp.float32)    # {0, 1}
    mask_ref[...] = keep[:, None, :]
    out_ref[...] = (x * keep.astype(x.dtype)[:, :, None]).astype(out_ref.dtype)


def _pick_batch_block(n, c, hw, itemsize, target_bytes=4 * 1024 * 1024):
    """Largest divisor of n whose (nb, C, HW) tile is <= ~target_bytes."""
    per_sample = c * hw * itemsize
    nb = int(max(1, min(n, target_bytes // max(per_sample, 1))))
    while n % nb != 0:
        nb -= 1
    return nb


def _ctrlb_fused_call(xf, u, k, nb):
    n, c, hw = xf.shape
    grid = (n // nb,)
    kernel = functools.partial(_ctrlb_fused_kernel, k=k)
    return pl.pallas_call(
        kernel,
        out_shape=(
            jax.ShapeDtypeStruct((n, c, hw), xf.dtype),
            jax.ShapeDtypeStruct((n, 1, c), jnp.float32),
        ),
        grid=grid,
        in_specs=[
            pl.BlockSpec((nb, 1, c), lambda i: (i, 0, 0)),
            pl.BlockSpec((nb, c, hw), lambda i: (i, 0, 0)),
        ],
        out_specs=(
            pl.BlockSpec((nb, c, hw), lambda i: (i, 0, 0)),
            pl.BlockSpec((nb, 1, c), lambda i: (i, 0, 0)),
        ),
        compiler_params=pltpu.CompilerParams(
            # Disjoint output block per step -> legally parallel; lets Mosaic
            # shard the batch grid across both TensorCores on v7x (neutral on
            # single-TC v5e/v6e).
            dimension_semantics=("parallel",),
            # Explicit VMEM budget: raises the 32 MiB scoped default for the
            # double-buffered x/out tiles while staying under v7x's 64 MiB.
            vmem_limit_bytes=48 * 1024 * 1024,
        ),
    )(u, xf)


@functools.partial(jax.jit, static_argnames=("training",))
def ctrlb_dropout2d(x, key, *, training=True):
    """Forward pass of CtrlbDropout2D. Returns (out, drop_mask, drops)."""
    if not training:
        # TODO(synk): eval path returns (x, None, None); torch returns x only.
        return x, None, None
    n, c, h, w = x.shape
    hw = h * w
    xf = x.reshape(n, c, hw)
    # TODO(synk): for late WRN stages with H*W < 128, a lane-dense repack of the
    # output (grouping channels onto the lane axis) would avoid masked stores.

    # Uniform draws for bernoulli(1 - prob); tiny (N, 1, C) array, host PRNG
    # (the in-kernel TPU stateful PRNG is not available in interpret fallback).
    u = jax.random.uniform(key, (n, 1, c), dtype=jnp.float32)

    k = math.floor(0.1 * c)
    nb = _pick_batch_block(n, c, hw, x.dtype.itemsize)

    out_flat, mask3 = _ctrlb_fused_call(xf, u, k, nb)
    drop_mask = mask3[:, 0, :]                                    # (N, C), f32

    # Running statistic; module state self.drops starts at 0 (single-step value),
    # computed in float32 regardless of x dtype.
    # TODO(synk): self.drops / self._iter cross-call Python state not modeled.
    drops = (0.0 + jnp.mean(jnp.sum(drop_mask, axis=1) / c)) / 2.0
    return out_flat.reshape(n, c, h, w), drop_mask, drops


if __name__ == "__main__":
    root = jax.random.PRNGKey(0)
    kx, kd = jax.random.split(root)
    N, C, H, W = 2, 32, 16, 16            # C=32 -> k = floor(0.1 * C) = 3
    x = jax.random.normal(kx, (N, C, H, W), dtype=jnp.float32)

    out, drop_mask, drops = ctrlb_dropout2d(x, kd, training=True)
    jax.block_until_ready((out, drop_mask, drops))

    # sanity: each channel is either fully kept or fully zeroed by the mask
    assert out.shape == x.shape
    assert bool(jnp.all((drop_mask == 0.0) | (drop_mask == 1.0)))
    assert jnp.allclose(out, x * drop_mask[:, :, None, None])
    assert bool(jnp.isfinite(drops))
    print("KERNEL_OK")
</pallas_src>

<mosaic_0001>
module attributes {stable_mosaic.version = 11 : i64} {
  func.func @_ctrlb_fused_kernel(%arg0: i32, %arg1: memref<2x1x32xf32, #tpu.memory_space<vmem>>, %arg2: memref<2x32x256xf32, #tpu.memory_space<vmem>>, %arg3: memref<2x32x256xf32, #tpu.memory_space<vmem>>, %arg4: memref<2x1x32xf32, #tpu.memory_space<vmem>>) attributes {dimension_semantics = [#tpu.dimension_semantics<parallel>], iteration_bounds = array<i64: 1>, scalar_prefetch = 0 : i64, scratch_operands = 0 : i64, tpu.core_type = #tpu.core_type<tc>, window_params = [{transform_indices = @transform_0, window_bounds = array<i64: 2, 1, 32>}, {transform_indices = @transform_1, window_bounds = array<i64: 2, 32, 256>}, {transform_indices = @transform_2, window_bounds = array<i64: 2, 32, 256>}, {transform_indices = @transform_3, window_bounds = array<i64: 2, 1, 32>}]} {
    %c0 = arith.constant 0 : index
    %c0_0 = arith.constant 0 : index
    %c0_1 = arith.constant 0 : index
    %0 = vector.load %arg2[%c0, %c0_0, %c0_1] : memref<2x32x256xf32, #tpu.memory_space<vmem>>, vector<2x32x256xf32>
    %cst = arith.constant dense<0.000000e+00> : vector<2x32xf32>
    %1 = vector.multi_reduction <add>, %0, %cst [2] : vector<2x32x256xf32> to vector<2x32xf32>
    %cst_2 = arith.constant 2.560000e+02 : f32
    %2 = vector.broadcast %cst_2 : f32 to vector<2x32xf32>
    %3 = arith.divf %1, %2 : vector<2x32xf32>
    %4 = math.absf %3 : vector<2x32xf32>
    %cst_3 = arith.constant dense<0xFF800000> : vector<2xf32>
    %5 = vector.multi_reduction <maximumf>, %4, %cst_3 [1] : vector<2x32xf32> to vector<2xf32>
    %6 = vector.shape_cast %5 : vector<2xf32> to vector<2x1xf32>
    %7 = vector.broadcast %6 : vector<2x1xf32> to vector<2x32xf32>
    %8 = arith.divf %4, %7 : vector<2x32xf32>
    %9 = tpu.iota {dimensions = array<i32: 1>} : vector<2x32xi32>
    %c0_i32 = arith.constant 0 : i32
    %cst_4 = arith.constant dense<0xFF800000> : vector<2xf32>
    %10 = vector.multi_reduction <maximumf>, %8, %cst_4 [1] : vector<2x32xf32> to vector<2xf32>
    %11 = vector.shape_cast %10 : vector<2xf32> to vector<2x1xf32>
    %12 = vector.broadcast %11 : vector<2x1xf32> to vector<2x32xf32>
    %13 = arith.cmpf oeq, %8, %12 : vector<2x32xf32>
    %c32_i32 = arith.constant 32 : i32
    %14 = vector.broadcast %c32_i32 : i32 to vector<2x32xi32>
    %15 = arith.select %13, %9, %14 : vector<2x32xi1>, vector<2x32xi32>
    %cst_5 = arith.constant dense<2147483647> : vector<2xi32>
    %16 = vector.multi_reduction <minsi>, %15, %cst_5 [1] : vector<2x32xi32> to vector<2xi32>
    %17 = vector.shape_cast %16 : vector<2xi32> to vector<2x1xi32>
    %18 = vector.broadcast %17 : vector<2x1xi32> to vector<2x32xi32>
    %19 = arith.cmpi eq, %9, %18 : vector<2x32xi32>
    %cst_6 = arith.constant dense<0x7F800000> : vector<2xf32>
    %20 = vector.multi_reduction <minimumf>, %8, %cst_6 [1] : vector<2x32xf32> to vector<2xf32>
    %21 = vector.shape_cast %20 : vector<2xf32> to vector<2x1xf32>
    %22 = vector.broadcast %21 : vector<2x1xf32> to vector<2x32xf32>
    %23 = arith.cmpf oeq, %8, %22 : vector<2x32xf32>
    %c32_i32_7 = arith.constant 32 : i32
    %24 = vector.broadcast %c32_i32_7 : i32 to vector<2x32xi32>
    %25 = arith.select %23, %9, %24 : vector<2x32xi1>, vector<2x32xi32>
    %cst_8 = arith.constant dense<2147483647> : vector<2xi32>
    %26 = vector.multi_reduction <minsi>, %25, %cst_8 [1] : vector<2x32xi32> to vector<2xi32>
    %27 = vector.shape_cast %26 : vector<2xi32> to vector<2x1xi32>
    %28 = vector.broadcast %27 : vector<2x1xi32> to vector<2x32xi32>
    %29 = arith.cmpi eq, %9, %28 : vector<2x32xi32>
    %30 = vector.shape_cast %21 : vector<2x1xf32> to vector<2x1xf32>
    %31 = vector.broadcast %30 : vector<2x1xf32> to vector<2x32xf32>
    %32 = arith.select %19, %31, %8 : vector<2x32xi1>, vector<2x32xf32>
    %cst_9 = arith.constant 0xFF800000 : f32
    %33 = vector.broadcast %cst_9 : f32 to vector<2x32xf32>
    %34 = arith.select %19, %33, %8 : vector<2x32xi1>, vector<2x32xf32>
    %cst_10 = arith.constant 0x7F800000 : f32
    %35 = vector.broadcast %cst_10 : f32 to vector<2x32xf32>
    %36 = arith.select %29, %35, %8 : vector<2x32xi1>, vector<2x32xf32>
    %c1_i32 = arith.constant 1 : i32
    %cst_11 = arith.constant dense<0xFF800000> : vector<2xf32>
    %37 = vector.multi_reduction <maximumf>, %34, %cst_11 [1] : vector<2x32xf32> to vector<2xf32>
    %38 = vector.shape_cast %37 : vector<2xf32> to vector<2x1xf32>
    %39 = vector.broadcast %38 : vector<2x1xf32> to vector<2x32xf32>
    %40 = arith.cmpf oeq, %34, %39 : vector<2x32xf32>
    %c32_i32_12 = arith.constant 32 : i32
    %41 = vector.broadcast %c32_i32_12 : i32 to vector<2x32xi32>
    %42 = arith.select %40, %9, %41 : vector<2x32xi1>, vector<2x32xi32>
    %cst_13 = arith.constant dense<2147483647> : vector<2xi32>
    %43 = vector.multi_reduction <minsi>, %42, %cst_13 [1] : vector<2x32xi32> to vector<2xi32>
    %44 = vector.shape_cast %43 : vector<2xi32> to vector<2x1xi32>
    %45 = vector.broadcast %44 : vector<2x1xi32> to vector<2x32xi32>
    %46 = arith.cmpi eq, %9, %45 : vector<2x32xi32>
    %cst_14 = arith.constant dense<0x7F800000> : vector<2xf32>
    %47 = vector.multi_reduction <minimumf>, %36, %cst_14 [1] : vector<2x32xf32> to vector<2xf32>
    %48 = vector.shape_cast %47 : vector<2xf32> to vector<2x1xf32>
    %49 = vector.broadcast %48 : vector<2x1xf32> to vector<2x32xf32>
    %50 = arith.cmpf oeq, %36, %49 : vector<2x32xf32>
    %c32_i32_15 = arith.constant 32 : i32
    %51 = vector.broadcast %c32_i32_15 : i32 to vector<2x32xi32>
    %52 = arith.select %50, %9, %51 : vector<2x32xi1>, vector<2x32xi32>
    %cst_16 = arith.constant dense<2147483647> : vector<2xi32>
    %53 = vector.multi_reduction <minsi>, %52, %cst_16 [1] : vector<2x32xi32> to vector<2xi32>
    %54 = vector.shape_cast %53 : vector<2xi32> to vector<2x1xi32>
    %55 = vector.broadcast %54 : vector<2x1xi32> to vector<2x32xi32>
    %56 = arith.cmpi eq, %9, %55 : vector<2x32xi32>
    %57 = vector.shape_cast %48 : vector<2x1xf32> to vector<2x1xf32>
    %58 = vector.broadcast %57 : vector<2x1xf32> to vector<2x32xf32>
    %59 = arith.select %46, %58, %32 : vector<2x32xi1>, vector<2x32xf32>
    %cst_17 = arith.constant 0xFF800000 : f32
    %60 = vector.broadcast %cst_17 : f32 to vector<2x32xf32>
    %61 = arith.select %46, %60, %34 : vector<2x32xi1>, vector<2x32xf32>
    %cst_18 = arith.constant 0x7F800000 : f32
    %62 = vector.broadcast %cst_18 : f32 to vector<2x32xf32>
    %63 = arith.select %56, %62, %36 : vector<2x32xi1>, vector<2x32xf32>
    %c2_i32 = arith.constant 2 : i32
    %cst_19 = arith.constant dense<0xFF800000> : vector<2xf32>
    %64 = vector.multi_reduction <maximumf>, %61, %cst_19 [1] : vector<2x32xf32> to vector<2xf32>
    %65 = vector.shape_cast %64 : vector<2xf32> to vector<2x1xf32>
    %66 = vector.broadcast %65 : vector<2x1xf32> to vector<2x32xf32>
    %67 = arith.cmpf oeq, %61, %66 : vector<2x32xf32>
    %c32_i32_20 = arith.constant 32 : i32
    %68 = vector.broadcast %c32_i32_20 : i32 to vector<2x32xi32>
    %69 = arith.select %67, %9, %68 : vector<2x32xi1>, vector<2x32xi32>
    %cst_21 = arith.constant dense<2147483647> : vector<2xi32>
    %70 = vector.multi_reduction <minsi>, %69, %cst_21 [1] : vector<2x32xi32> to vector<2xi32>
    %71 = vector.shape_cast %70 : vector<2xi32> to vector<2x1xi32>
    %72 = vector.broadcast %71 : vector<2x1xi32> to vector<2x32xi32>
    %73 = arith.cmpi eq, %9, %72 : vector<2x32xi32>
    %cst_22 = arith.constant dense<0x7F800000> : vector<2xf32>
    %74 = vector.multi_reduction <minimumf>, %63, %cst_22 [1] : vector<2x32xf32> to vector<2xf32>
    %75 = vector.shape_cast %74 : vector<2xf32> to vector<2x1xf32>
    %76 = vector.broadcast %75 : vector<2x1xf32> to vector<2x32xf32>
    %77 = arith.cmpf oeq, %63, %76 : vector<2x32xf32>
    %c32_i32_23 = arith.constant 32 : i32
    %78 = vector.broadcast %c32_i32_23 : i32 to vector<2x32xi32>
    %79 = arith.select %77, %9, %78 : vector<2x32xi1>, vector<2x32xi32>
    %cst_24 = arith.constant dense<2147483647> : vector<2xi32>
    %80 = vector.multi_reduction <minsi>, %79, %cst_24 [1] : vector<2x32xi32> to vector<2xi32>
    %81 = vector.shape_cast %80 : vector<2xi32> to vector<2x1xi32>
    %82 = vector.broadcast %81 : vector<2x1xi32> to vector<2x32xi32>
    %83 = arith.cmpi eq, %9, %82 : vector<2x32xi32>
    %84 = vector.shape_cast %75 : vector<2x1xf32> to vector<2x1xf32>
    %85 = vector.broadcast %84 : vector<2x1xf32> to vector<2x32xf32>
    %86 = arith.select %73, %85, %59 : vector<2x32xi1>, vector<2x32xf32>
    %cst_25 = arith.constant 0xFF800000 : f32
    %87 = vector.broadcast %cst_25 : f32 to vector<2x32xf32>
    %88 = arith.select %73, %87, %61 : vector<2x32xi1>, vector<2x32xf32>
    %cst_26 = arith.constant 0x7F800000 : f32
    %89 = vector.broadcast %cst_26 : f32 to vector<2x32xf32>
    %90 = arith.select %83, %89, %63 : vector<2x32xi1>, vector<2x32xf32>
    %cst_27 = arith.constant 0.000000e+00 : f32
    %cst_28 = arith.constant 1.000000e+00 : f32
    %91 = vector.broadcast %cst_27 : f32 to vector<2x32xf32>
    %92 = arith.maximumf %91, %86 : vector<2x32xf32>
    %93 = vector.broadcast %cst_28 : f32 to vector<2x32xf32>
    %94 = arith.minimumf %93, %92 : vector<2x32xf32>
    %c0_29 = arith.constant 0 : index
    %c0_30 = arith.constant 0 : index
    %c0_31 = arith.constant 0 : index
    %95 = vector.load %arg1[%c0_29, %c0_30, %c0_31] : memref<2x1x32xf32, #tpu.memory_space<vmem>>, vector<2x1x32xf32>
    %96 = vector.shape_cast %95 : vector<2x1x32xf32> to vector<2x32xf32>
    %cst_32 = arith.constant 1.000000e+00 : f32
    %97 = vector.broadcast %cst_32 : f32 to vector<2x32xf32>
    %98 = arith.subf %97, %94 : vector<2x32xf32>
    %99 = arith.cmpf olt, %96, %98 : vector<2x32xf32>
    %100 = arith.extui %99 : vector<2x32xi1> to vector<2x32xi32>
    %101 = arith.sitofp %100 : vector<2x32xi32> to vector<2x32xf32>
    %102 = vector.shape_cast %101 : vector<2x32xf32> to vector<2x1x32xf32>
    %c0_33 = arith.constant 0 : index
    %c0_34 = arith.constant 0 : index
    %c0_35 = arith.constant 0 : index
    %103 = vector.load %arg4[%c0_33, %c0_34, %c0_35] : memref<2x1x32xf32, #tpu.memory_space<vmem>>, vector<2x1x32xf32>
    tpu.vector_store %arg4[%c0_33, %c0_34, %c0_35], %102 {strides = array<i32>} : memref<2x1x32xf32, #tpu.memory_space<vmem>>, vector<2x1x32xf32>,
    %104 = vector.shape_cast %101 : vector<2x32xf32> to vector<2x32x1xf32>
    %105 = vector.broadcast %104 : vector<2x32x1xf32> to vector<2x32x256xf32>
    %106 = arith.mulf %0, %105 : vector<2x32x256xf32>
    %c0_36 = arith.constant 0 : index
    %c0_37 = arith.constant 0 : index
    %c0_38 = arith.constant 0 : index
    %107 = vector.load %arg3[%c0_36, %c0_37, %c0_38] : memref<2x32x256xf32, #tpu.memory_space<vmem>>, vector<2x32x256xf32>
    tpu.vector_store %arg3[%c0_36, %c0_37, %c0_38], %106 {strides = array<i32>} : memref<2x32x256xf32, #tpu.memory_space<vmem>>, vector<2x32x256xf32>,
    return
  }
  func.func @transform_0(%arg0: i32) -> (i32, i32, i32) {
    %c0_i32 = arith.constant 0 : i32
    %c0_i32_0 = arith.constant 0 : i32
    %c0_i32_1 = arith.constant 0 : i32
    return %arg0, %c0_i32, %c0_i32_0 : i32, i32, i32
  }
  func.func @transform_1(%arg0: i32) -> (i32, i32, i32) {
    %c0_i32 = arith.constant 0 : i32
    %c0_i32_0 = arith.constant 0 : i32
    %c0_i32_1 = arith.constant 0 : i32
    return %arg0, %c0_i32, %c0_i32_0 : i32, i32, i32
  }
  func.func @transform_2(%arg0: i32) -> (i32, i32, i32) {
    %c0_i32 = arith.constant 0 : i32
    %c0_i32_0 = arith.constant 0 : i32
    %c0_i32_1 = arith.constant 0 : i32
    return %arg0, %c0_i32, %c0_i32_0 : i32, i32, i32
  }
  func.func @transform_3(%arg0: i32) -> (i32, i32, i32) {
    %c0_i32 = arith.constant 0 : i32
    %c0_i32_0 = arith.constant 0 : i32
    %c0_i32_1 = arith.constant 0 : i32
    return %arg0, %c0_i32, %c0_i32_0 : i32, i32, i32
  }
}

</mosaic_0001>

<bundles_post_ra>
// kernel: ctrlb_dropout2d.1
= control target key start
LH: loop header
LB: loop body
LE: loop exit
PB: predicated region body
PF: predicated region fallthrough
CT: control target
= control target key end

     0   :  { %v609_v24 = vmov 256.0   ;;  %v84_v33 = vlaneseq  ;;  %vm89_vm1 = vcmask 130112   ;;  %vm93_vm2 = vcmask 195712   ;;  %s1057_s1 = inlined_call_operand.vmem [shape: f32[2,32,256], index: 1, kind: input, shape index: {}]   ;;  %s1058_s0 = inlined_call_operand.vmem [shape: f32[2,1,32], index: 0, kind: input, shape index: {}]   ;;  %s1059_s3 = inlined_call_operand.vmem [shape: f32[2,1,32], index: 3, kind: output, shape index: {1}]   ;;  %s1060_s2 = inlined_call_operand.vmem [shape: f32[2,32,256], index: 2, kind: output, shape index: {0}]  }
   0x1   :  { %v635_v0 = vld [vmem:[%s1057_s1 + $0x40] sm:$0xff]  ;;  %v640_v1 = vld [vmem:[%s1057_s1 + $0x48] sm:$0xff]  ;;  %v671_v9 = vld [vmem:[%s1057_s1 + $0x50] sm:$0xff]  ;;  %603 = vrcp.f32 %v609_v24  ;;  %vm97_vm3 = vcmask 261312   ;;  %vm106_vm4 = vcmask 1041409   ;;  %vm109_vm5 = vcmask 254976  }
   0x2   :  { %v645_v2 = vld [vmem:[%s1057_s1] sm:$0xff]  ;;  %v41_v3 = vadd.f32 %v640_v1, %v635_v0  ;;  %v652_v4 = vld [vmem:[%s1057_s1 + $0x8] sm:$0xff]  ;;  %v676_v10 = vld [vmem:[%s1057_s1 + $0x58] sm:$0xff]  ;;  %v729_v36 = vand.u32 127, %v84_v33 }
   0x3   :  { %v657_v5 = vld [vmem:[%s1057_s1 + $0x20] sm:$0xff]  ;;  %v662_v6 = vld [vmem:[%s1057_s1 + $0x28] sm:$0xff]  ;;  %v29_v7 = vadd.f32 %v652_v4, %v645_v2  ;;  %v681_v11 = vld [vmem:[%s1057_s1 + $0x10] sm:$0xff]  ;;  %v44_v15 = vadd.f32 %v676_v10, %v671_v9 }
   0x4   :  { %v35_v8 = vadd.f32 %v662_v6, %v657_v5  ;;  %42 = vadd.xlane.f32.xlu1 %v41_v3  ;;  %v686_v12 = vld [vmem:[%s1057_s1 + $0x18] sm:$0xff]  ;;  %v691_v13 = vld [vmem:[%s1057_s1 + $0x60] sm:$0xff]  ;;  %v696_v14 = vld [vmem:[%s1057_s1 + $0x68] sm:$0xff]  ;;  %v742_v44 = vadd.s32 4294967288, %v729_v36  ;;  %v755_v52 = vadd.s32 4294967280, %v729_v36  ;;  %v765_v57 = vadd.s32 4294967272, %v729_v36 }
   0x5   :  { %30 = vadd.xlane.f32.xlu0 %v29_v7  ;;  %v32_v16 = vadd.f32 %v686_v12, %v681_v11  ;;  %v47_v17 = vadd.f32 %v696_v14, %v691_v13  ;;  %v707_v18 = vld [vmem:[%s1057_s1 + $0x70] sm:$0xff]  ;;  %v712_v19 = vld [vmem:[%s1057_s1 + $0x78] sm:$0xff] }
   0x6   :  { %36 = vadd.xlane.f32.xlu2 %v35_v8  ;;  %v717_v20 = vld [vmem:[%s1057_s1 + $0x30] sm:$0xff]  ;;  %v722_v21 = vld [vmem:[%s1057_s1 + $0x38] sm:$0xff]  ;;  %v50_v22 = vadd.f32 %v712_v19, %v707_v18 }
   0x7   :  { %v38_v23 = vadd.f32 %v722_v21, %v717_v20  ;;  %v604_v25 = vpop.eup %603 }
   0x8   :  { %v54_v26 = vmul.f32 256.0, %v604_v25  ;;  %vm58_vm0 = vweird.f32 %v604_v25 }
   0xa   :  { %v55_v27 = vsub.f32 1.0, %v54_v26 }
   0xc   :  { %45 = vadd.xlane.f32.xlu1 %v44_v15  ;;  %v56_v28 = vmul.f32 %v604_v25, %v55_v27 }
   0xd   :  { %33 = vadd.xlane.f32.xlu0 %v32_v16 }
   0xe   :  { %48 = vadd.xlane.f32.xlu2 %v47_v17  ;;  %v57_v32 = vadd.f32 %v604_v25, %v56_v28  ;;  %v610_v28 = vmov 0  }
   0xf   :  { %571 = vset.pattern.permute.xlu2 %v610_v28  ;;  %570 = vset.pattern.permute.xlu1 %v610_v28 }
  0x10   :  { %v59_v34 = vsel %vm58_vm0, %v604_v25, %v57_v32  ;;  %569 = vset.pattern.permute.xlu0 %v610_v28 }
  0x14   :  { %51 = vadd.xlane.f32.xlu1 %v50_v22 }
  0x15   :  { %39 = vadd.xlane.f32.xlu0 %v38_v23 }
  0x77   :  { %v43_v29 = vpop.xlane.xlu1 %42 }
  0x78   :  { %v31_v30 = vpop.xlane.xlu0 %30  ;;  %v731_v37 = vmul.f32 %v59_v34, %v43_v29 }
  0x79   :  { %v37_v31 = vpop.xlane.xlu2 %36  ;;  %v735_v41 = vmul.f32 %v59_v34, %v31_v30 }
  0x7a   :  { %v72_v47 = vand.u32 2147483647, %v731_v37  ;;  %v747_v48 = vmul.f32 %v59_v34, %v37_v31 }
  0x7b   :  { %v68_v49 = vand.u32 2147483647, %v735_v41 }
  0x7c   :  { %v99_v55 = vperm.slane %v72_v47, %v729_v36  ;;  %v70_v56 = vand.u32 2147483647, %v747_v48 }
  0x7d   :  { %v86_v60 = vperm.slane %v68_v49, %v729_v36 }
  0x7e   :  { %v92_v15 = vperm.slane %v70_v56, %v755_v52 }
  0x7f   :  { %v46_v35 = vpop.xlane.xlu1 %45 }
  0x80   :  { %v733_v38 = vmul.f32 %v59_v34, %v46_v35  ;;  %v34_v39 = vpop.xlane.xlu0 %33 }
  0x81   :  { %v49_v40 = vpop.xlane.xlu2 %48  ;;  %v737_v42 = vmul.f32 %v59_v34, %v34_v39 }
  0x82   :  { %v739_v43 = vmul.f32 %v59_v34, %v49_v40  ;;  %v73_v45 = vand.u32 2147483647, %v733_v38  ;;  %v836_v38 = vshrl.u32 %v84_v33, 7 }
  0x83   :  { %v69_v46 = vand.u32 2147483647, %v737_v42 }
  0x84   :  { %v74_v50 = vand.u32 2147483647, %v739_v43  ;;  %v100_v51 = vperm.slane %v73_v45, %v742_v44  ;;  %v846_v43 = vadd.s32 24, %v836_v38 }
  0x85   :  { %v88_v53 = vperm.slane %v69_v46, %v742_v44 }
  0x86   :  { %v102_v61 = vperm.slane %v74_v50, %v755_v52  ;;  %v101_v63 = vsel %vm89_vm1, %v100_v51, %v99_v55 }
  0x87   :  { %v52_v54 = vpop.xlane.xlu1 %51  ;;  %v90_v7 = vsel %vm89_vm1, %v88_v53, %v86_v60 }
  0x88   :  { %v767_v58 = vmul.f32 %v59_v34, %v52_v54  ;;  %v40_v59 = vpop.xlane.xlu0 %39  ;;  %v103_v22 = vsel %vm93_vm2, %v102_v61, %v101_v63  ;;  %v94_v23 = vsel %vm93_vm2, %v92_v15, %v90_v7 }
  0x89   :  { %v775_v62 = vmul.f32 %v59_v34, %v40_v59 }
  0x8a   :  { %v75_v3 = vand.u32 2147483647, %v767_v58 }
  0x8b   :  { %v71_v8 = vand.u32 2147483647, %v775_v62 }
  0x8c   :  { %v104_v16 = vperm.slane %v75_v3, %v765_v57 }
  0x8d   :  { %v96_v17 = vperm.slane %v71_v8, %v765_v57 }
  0x8e   :  { %v105_v24 = vsel %vm97_vm3, %v104_v16, %v103_v22 }
  0x8f   :  { %v98_v25 = vsel %vm97_vm3, %v96_v17, %v94_v23 }
  0x90   :  { %v107_v26 = vsel %vm106_vm4, %v105_v24, %v98_v25 }
  0x91   :  { %v110_v27 = vsel %vm109_vm5, %v107_v26, -inf }
  0x92   :  { %111 = vmax.xlane.f32.xlu2 %v110_v27 }
 0x105   :  { %v112_v29 = vpop.xlane.xlu2 %111 }
 0x106   :  { %v114_v30 = vperm.slane %v112_v29, 0  ;;  %v115_v31 = vperm.slane %v112_v29, 1 }
 0x108   :  { %605 = vrcp.f32 %v114_v30  ;;  %v129_v53 = vand.u32 2147483648, %v114_v30  ;;  %v147_v54 = vand.u32 2147483648, %v115_v31  ;;  %v127_v58 = vand.u32 2147483647, %v114_v30 }
 0x109   :  { %607 = vrcp.f32 %v115_v31  ;;  %v145_v60 = vand.u32 2147483647, %v115_v31  ;;  %vm123_vm8 = vweird.f32 %v114_v30  ;;  %vm141_vm9 = vweird.f32 %v115_v31 }
 0x10a   :  { %v130_v7 = vor.u32 1.1754944e-38, %v129_v53  ;;  %v148_v15 = vor.u32 1.1754944e-38, %v147_v54  ;;  %vm128_vm12 = vcmp.eq.f32.partialorder %v127_v58, 8.507059e+37 }
 0x10b   :  { %vm146_vm13 = vcmp.eq.f32.partialorder %v145_v60, 8.507059e+37 }
 0x10e   :  { %v606_v32 = vpop.eup %605 }
 0x10f   :  { %v608_v34 = vpop.eup %607  ;;  %v119_v35 = vmul.f32 %v606_v32, %v114_v30  ;;  %vm124_vm6 = vweird.f32 %v606_v32 }
 0x110   :  { %v137_v39 = vmul.f32 %v608_v34, %v115_v31  ;;  %vm142_vm7 = vweird.f32 %v608_v34  ;;  %vm125_vm10 = vmor %vm123_vm8, %vm124_vm6 }
 0x111   :  { %v120_v40 = vsub.f32 1.0, %v119_v35  ;;  %vm143_vm11 = vmor %vm141_vm9, %vm142_vm7 }
 0x112   :  { %v138_v51 = vsub.f32 1.0, %v137_v39 }
 0x113   :  { %v121_v55 = vmul.f32 %v606_v32, %v120_v40 }
 0x114   :  { %v139_v59 = vmul.f32 %v608_v34, %v138_v51 }
 0x115   :  { %v122_v61 = vadd.f32 %v606_v32, %v121_v55 }
 0x116   :  { %v140_v63 = vadd.f32 %v608_v34, %v139_v59 }
 0x117   :  { %v126_v16 = vsel %vm125_vm10, %v606_v32, %v122_v61 }
 0x118   :  { %v144_v17 = vsel %vm143_vm11, %v608_v34, %v140_v63  ;;  %v131_v22 = vsel %vm128_vm12, %v130_v7, %v126_v16 }
 0x119   :  { %v149_v23 = vsel %vm146_vm13, %v148_v15, %v144_v17  ;;  %v799_v24 = vmul.f32 %v131_v22, %v69_v46  ;;  %v803_v25 = vmul.f32 %v131_v22, %v68_v49  ;;  %v814_v27 = vmul.f32 %v131_v22, %v70_v56 }
 0x11a   :  { %v807_v26 = vmul.f32 %v149_v23, %v72_v47  ;;  %v816_v42 = vmul.f32 %v149_v23, %v75_v3  ;;  %v820_v41 = vmul.f32 %v149_v23, %v73_v45  ;;  %v827_v37 = vmul.f32 %v131_v22, %v71_v8 }
 0x11b   :  { %166 = vperm.xlu1 %570, %v799_v24   ;;  %163 = vperm.xlu0 %569, %v803_v25   ;;  %v831_v46 = vmul.f32 %v149_v23, %v74_v50  ;;  %v841_v45 = vadd.s32 16, %v836_v38  ;;  %v849_v47 = vadd.s32 8, %v836_v38 }
 0x11c   :  { %175 = vperm.xlu2 %571, %v807_v26  }
 0x123   :  { %169 = vperm.xlu1 %570, %v814_v27   ;;  %184 = vperm.xlu0 %569, %v816_v42  }
 0x124   :  { %178 = vperm.xlu2 %571, %v820_v41  }
 0x12b   :  { %172 = vperm.xlu1 %570, %v827_v37   ;;  %573 = vset.pattern.permute.xlu0 %v849_v47 }
 0x12c   :  { %181 = vperm.xlu2 %571, %v831_v46  }
 0x133   :  { %572 = vset.pattern.permute.xlu1 %v836_v38  ;;  %228 = vperm.xlu0 %573, %v729_v36  }
 0x13b   :  { %222 = vperm.xlu1 %572, %v729_v36   ;;  %576 = vset.pattern.permute.xlu0 %v610_v28 }
 0x143   :  { %574 = vset.pattern.permute.xlu1 %v841_v45 }
 0x14b   :  { %234 = vperm.xlu1 %574, %v729_v36  }
 0x153   :  { %575 = vset.pattern.permute.xlu1 %v846_v43 }
 0x15b   :  { %240 = vperm.xlu1 %575, %v729_v36  }
 0x163   :  { %577 = vset.pattern.permute.xlu1 %v610_v28 }
 0x176   :  { %v176_v33 = vpop.permute.xlu2 %175 }
 0x177   :  { %v193_v34 = vperm.slane %v176_v33, %v729_v36 }
 0x17e   :  { %v179_v49 = vpop.permute.xlu2 %178 }
 0x17f   :  { %v194_v8 = vperm.slane %v179_v49, %v742_v44 }
 0x181   :  { %v195_v28 = vsel %vm89_vm1, %v194_v8, %v193_v34 }
 0x186   :  { %v182_v62 = vpop.permute.xlu2 %181 }
 0x187   :  { %v196_v31 = vperm.slane %v182_v62, %v755_v52 }
 0x189   :  { %v197_v53 = vsel %vm93_vm2, %v196_v31, %v195_v28 }
 0x18d   :  { %v167_v48 = vpop.permute.xlu1 %166  ;;  %v164_v50 = vpop.permute.xlu0 %163 }
 0x18e   :  { %v187_v29 = vperm.slane %v167_v48, %v742_v44  ;;  %v186_v30 = vperm.slane %v164_v50, %v729_v36 }
 0x190   :  { %v188_v40 = vsel %vm89_vm1, %v187_v29, %v186_v30 }
 0x195   :  { %v170_v56 = vpop.permute.xlu1 %169  ;;  %v185_v3 = vpop.permute.xlu0 %184 }
 0x196   :  { %v189_v32 = vperm.slane %v170_v56, %v755_v52  ;;  %v198_v35 = vperm.slane %v185_v3, %v765_v57 }
 0x198   :  { %v190_v54 = vsel %vm93_vm2, %v189_v32, %v188_v40  ;;  %v199_v55 = vsel %vm97_vm3, %v198_v35, %v197_v53 }
 0x19d   :  { %v173_v39 = vpop.permute.xlu1 %172 }
 0x19e   :  { %v191_v51 = vperm.slane %v173_v39, %v765_v57 }
 0x1a0   :  { %v192_v58 = vsel %vm97_vm3, %v191_v51, %v190_v54 }
 0x1a1   :  { %v872_v59 = vsel %vm106_vm4, %v199_v55, %v192_v58 }
 0x1a2   :  { %v202_v60 = vsel %vm109_vm5, %v872_v59, -inf  ;;  %v305_v8 = vsel %vm109_vm5, %v872_v59, inf }
 0x1a3   :  { %203 = vmax.xlane.f32.xlu2 %v202_v60 }
 0x1a5   :  { %v876_v16 = vpop.permute.xlu0 %228 }
 0x1ad   :  { %v223_v61 = vpop.permute.xlu1 %222 }
 0x1bd   :  { %v878_v17 = vpop.permute.xlu1 %234 }
 0x1cd   :  { %v888_v50 = vpop.permute.xlu1 %240 }
 0x216   :  { %v204_v63 = vpop.xlane.xlu2 %203 }
 0x217   :  { %v206_v7 = vperm.slane %v204_v63, 0  ;;  %v207_v15 = vperm.slane %v204_v63, 1 }
 0x219   :  { %vm216_vm14 = vcmp.eq.f32.partialorder %v831_v46, %v207_v15  ;;  %vm210_vm15 = vcmp.eq.f32.partialorder %v803_v25, %v206_v7  ;;  %vm211_vm0 = vcmp.eq.f32.partialorder %v799_v24, %v206_v7  ;;  %vm215_vm6 = vcmp.eq.f32.partialorder %v820_v41, %v207_v15 }
 0x21a   :  { %v248_v22 = vsel %vm216_vm14, %v878_v17, 32  ;;  %v242_v23 = vsel %vm210_vm15, %v223_v61, 32  ;;  %v243_v33 = vsel %vm211_vm0, %v876_v16, 32  ;;  %vm214_vm7 = vcmp.eq.f32.partialorder %v807_v26, %v207_v15 }
 0x21b   :  { %269 = vperm.xlu2 %571, %v248_v22   ;;  %251 = vperm.xlu0 %576, %v242_v23   ;;  %v247_v48 = vsel %vm215_vm6, %v876_v16, 32  ;;  %v246_v49 = vsel %vm214_vm7, %v223_v61, 32  ;;  %vm213_vm8 = vcmp.eq.f32.partialorder %v827_v37, %v206_v7  ;;  %vm212_vm9 = vcmp.eq.f32.partialorder %v814_v27, %v206_v7 }
 0x21c   :  { %254 = vperm.xlu1 %577, %v243_v33   ;;  %v245_v56 = vsel %vm213_vm8, %v888_v50, 32  ;;  %v244_v62 = vsel %vm212_vm9, %v878_v17, 32  ;;  %vm217_vm10 = vcmp.eq.f32.partialorder %v816_v42, %v207_v15 }
 0x21d   :  { %v249_v3 = vsel %vm217_vm10, %v888_v50, 32 }
 0x223   :  { %266 = vperm.xlu0 %576, %v247_v48  }
 0x224   :  { %263 = vperm.xlu1 %577, %v246_v49  }
 0x22b   :  { %260 = vperm.xlu0 %576, %v245_v56  }
 0x22c   :  { %257 = vperm.xlu1 %577, %v244_v62  }
 0x234   :  { %272 = vperm.xlu1 %577, %v249_v3  }
 0x25e   :  { %306 = vmin.xlane.f32.xlu1 %v305_v8 }
 0x275   :  { %v270_v58 = vpop.permute.xlu2 %269 }
 0x276   :  { %v284_v15 = vperm.slane %v270_v58, %v755_v52 }
 0x28d   :  { %v252_v53 = vpop.permute.xlu0 %251 }
 0x28e   :  { %v255_v29 = vpop.permute.xlu1 %254 }
 0x28f   :  { %v275_v60 = vperm.slane %v255_v29, %v742_v44 }
 0x296   :  { %v264_v30 = vpop.permute.xlu1 %263 }
 0x29e   :  { %v258_v31 = vpop.permute.xlu1 %257 }
 0x2a6   :  { %v273_v32 = vpop.permute.xlu1 %272 }
 0x2d1   :  { %v898_v34 = vpop.xlane.xlu1 %306 }
 0x2d2   :  { %v309_v35 = vperm.slane %v898_v34, 0  ;;  %v310_v39 = vperm.slane %v898_v34, 1 }
 0x2d4   :  { %vm317_vm11 = vcmp.eq.f32.partialorder %v807_v26, %v310_v39  ;;  %vm314_vm12 = vcmp.eq.f32.partialorder %v799_v24, %v309_v35  ;;  %vm313_vm13 = vcmp.eq.f32.partialorder %v803_v25, %v309_v35  ;;  %vm315_vm14 = vcmp.eq.f32.partialorder %v814_v27, %v309_v35  ;;  %v267_v26 = vpop.permute.xlu0 %266 }
 0x2d5   :  { %v325_v28 = vsel %vm317_vm11, %v223_v61, 32  ;;  %v322_v40 = vsel %vm314_vm12, %v876_v16, 32  ;;  %v321_v51 = vsel %vm313_vm13, %v223_v61, 32  ;;  %v323_v54 = vsel %vm315_vm14, %v878_v17, 32 }
 0x2d6   :  { %342 = vperm.xlu2 %571, %v325_v28   ;;  %333 = vperm.xlu1 %577, %v322_v40   ;;  %vm320_vm15 = vcmp.eq.f32.partialorder %v816_v42, %v310_v39  ;;  %v281_v25 = vperm.slane %v264_v30, %v729_v36  ;;  %v282_v55 = vperm.slane %v267_v26, %v742_v44 }
 0x2d7   :  { %330 = vperm.xlu0 %576, %v321_v51   ;;  %v328_v24 = vsel %vm320_vm15, %v888_v50, 32  ;;  %v274_v61 = vperm.slane %v252_v53, %v729_v36  ;;  %v277_v27 = vperm.slane %v258_v31, %v755_v52  ;;  %v286_v42 = vperm.slane %v273_v32, %v765_v57 }
 0x2d8   :  { %v283_v7 = vsel %vm89_vm1, %v282_v55, %v281_v25  ;;  %vm318_vm0 = vcmp.eq.f32.partialorder %v820_v41, %v310_v39  ;;  %vm319_vm6 = vcmp.eq.f32.partialorder %v831_v46, %v310_v39  ;;  %vm316_vm8 = vcmp.eq.f32.partialorder %v827_v37, %v309_v35 }
 0x2d9   :  { %v276_v22 = vsel %vm89_vm1, %v275_v60, %v274_v61  ;;  %v285_v48 = vsel %vm93_vm2, %v284_v15, %v283_v7  ;;  %v326_v29 = vsel %vm318_vm0, %v876_v16, 32  ;;  %v327_v30 = vsel %vm319_vm6, %v878_v17, 32 }
 0x2da   :  { %v278_v33 = vsel %vm93_vm2, %v277_v27, %v276_v22  ;;  %v287_v49 = vsel %vm97_vm3, %v286_v42, %v285_v48  ;;  %v324_v41 = vsel %vm316_vm8, %v888_v50, 32  ;;  %vm471_vm6 = vcmask 253952  }
 0x2dc   :  { %v261_v63 = vpop.permute.xlu0 %260 }
 0x2dd   :  { %v279_v23 = vperm.slane %v261_v63, %v765_v57 }
 0x2de   :  { %336 = vperm.xlu1 %577, %v323_v54  }
 0x2df   :  { %v280_v56 = vsel %vm97_vm3, %v279_v23, %v278_v33 }
 0x2e0   :  { %v288_v62 = vsel %vm106_vm4, %v287_v49, %v280_v56 }
 0x2e1   :  { %v289_v3 = vsel %vm109_vm5, %v288_v62, 2147483647 }
 0x2e2   :  { %v291_v8 = vshra.s32 %v289_v3, 16  ;;  %v290_v32 = vand.u32 65535, %v289_v3 }
 0x2e4   :  { %v292_v40 = vcvt.s32.f32 %v290_v32 }
 0x2e6   :  { %351 = vperm.xlu1 %577, %v328_v24  }
 0x2ee   :  { %590 = vset.pattern.permute.xlu1 %v841_v45  ;;  %v293_v45 = vcvt.s32.f32 %v291_v8 }
 0x301   :  { %294 = vmin.xlane.f32.xlu0 %v293_v45 }
 0x315   :  { %345 = vperm.xlu0 %576, %v326_v29  }
 0x31d   :  { %348 = vperm.xlu0 %576, %v327_v30  }
 0x325   :  { %578 = vset.pattern.permute.xlu0 %v836_v38 }
 0x330   :  { %v343_v17 = vpop.permute.xlu2 %342 }
 0x331   :  { %v360_v50 = vperm.slane %v343_v17, %v729_v36 }
 0x348   :  { %v334_v46 = vpop.permute.xlu1 %333 }
 0x349   :  { %v331_v31 = vpop.permute.xlu0 %330  ;;  %v354_v35 = vperm.slane %v334_v46, %v742_v44 }
 0x350   :  { %v337_v39 = vpop.permute.xlu1 %336 }
 0x351   :  { %v356_v58 = vperm.slane %v337_v39, %v755_v52 }
 0x358   :  { %v352_v60 = vpop.permute.xlu1 %351 }
 0x359   :  { %v365_v15 = vperm.slane %v352_v60, %v765_v57 }
 0x374   :  { %v295_v28 = vpop.xlane.xlu0 %294 }
 0x375   :  { %vm296_vm7 = vcmp.eq.f32.partialorder %v293_v45, %v295_v28  ;;  %v301_v53 = vcvt.f32.s32 %v295_v28 }
 0x376   :  { %v297_v51 = vsel %vm296_vm7, %v292_v40, inf }
 0x377   :  { %298 = vmin.xlane.f32.xlu2 %v297_v51  ;;  %v302_v54 = vshll.u32 %v301_v53, 16 }
 0x387   :  { %v346_v16 = vpop.permute.xlu0 %345 }
 0x388   :  { %v361_v25 = vperm.slane %v346_v16, %v742_v44 }
 0x38a   :  { %v362_v27 = vsel %vm89_vm1, %v361_v25, %v360_v50 }
 0x38f   :  { %339 = vperm.xlu2 %571, %v324_v41   ;;  %v349_v26 = vpop.permute.xlu0 %348 }
 0x390   :  { %v363_v37 = vperm.slane %v349_v26, %v755_v52 }
 0x392   :  { %v364_v7 = vsel %vm93_vm2, %v363_v37, %v362_v27 }
 0x393   :  { %v366_v33 = vsel %vm97_vm3, %v365_v15, %v364_v7 }
 0x397   :  { %584 = vset.pattern.permute.xlu2 %v849_v47  ;;  %v353_v47 = vperm.slane %v331_v31, %v729_v36 }
 0x399   :  { %v355_v42 = vsel %vm89_vm1, %v354_v35, %v353_v47 }
 0x39a   :  { %v357_v22 = vsel %vm93_vm2, %v356_v58, %v355_v42 }
 0x3ea   :  { %v299_v38 = vpop.xlane.xlu2 %298 }
 0x3eb   :  { %v300_v24 = vcvt.f32.s32 %v299_v38 }
 0x3ed   :  { %v936_v55 = vadd.s32 %v302_v54, %v300_v24 }
 0x3ef   :  { %vm304_vm9 = vcmp.eq.s32.totalorder %v729_v36, %v936_v55 }
 0x3f0   :  { %v385_v61 = vsel %vm304_vm9, -inf, %v872_v59  ;;  %v384_v60 = vsel %vm304_vm9, %v898_v34, %v872_v59 }
 0x3f1   :  { %v387_v63 = vsel %vm109_vm5, %v385_v61, -inf }
 0x3f2   :  { %388 = vmax.xlane.f32.xlu0 %v387_v63  ;;  %v340_v44 = vpop.permute.xlu2 %339 }
 0x3f3   :  { %v358_v52 = vperm.slane %v340_v44, %v765_v57 }
 0x3f5   :  { %v359_v23 = vsel %vm97_vm3, %v358_v52, %v357_v22 }
 0x3f6   :  { %v367_v48 = vsel %vm106_vm4, %v366_v33, %v359_v23 }
 0x3f7   :  { %v368_v49 = vsel %vm109_vm5, %v367_v48, 2147483647 }
 0x3f8   :  { %v370_v56 = vshra.s32 %v368_v49, 16  ;;  %v369_v30 = vand.u32 65535, %v368_v49 }
 0x3fa   :  { %v372_v62 = vcvt.s32.f32 %v370_v56  ;;  %v371_v32 = vcvt.s32.f32 %v369_v30 }
 0x3fc   :  { %373 = vmin.xlane.f32.xlu2 %v372_v62 }
 0x465   :  { %v389_v3 = vpop.xlane.xlu0 %388 }
 0x466   :  { %vm390_vm10 = vcmp.eq.f32.partialorder %v385_v61, %v389_v3 }
 0x467   :  { %v391_v8 = vsel %vm390_vm10, %v729_v36, 32 }
 0x468   :  { %v392_v45 = vsel %vm109_vm5, %v391_v8, 2147483647 }
 0x469   :  { %v394_v57 = vshra.s32 %v392_v45, 16  ;;  %v393_v40 = vand.u32 65535, %v392_v45 }
 0x46b   :  { %v396_v29 = vcvt.s32.f32 %v394_v57  ;;  %v395_v41 = vcvt.s32.f32 %v393_v40 }
 0x46d   :  { %397 = vmin.xlane.f32.xlu0 %v396_v29 }
 0x46f   :  { %v374_v31 = vpop.xlane.xlu2 %373 }
 0x470   :  { %vm375_vm1 = vcmp.eq.f32.partialorder %v372_v62, %v374_v31  ;;  %v380_v46 = vcvt.f32.s32 %v374_v31 }
 0x471   :  { %v376_v28 = vsel %vm375_vm1, %v371_v32, inf }
 0x472   :  { %377 = vmin.xlane.f32.xlu1 %v376_v28  ;;  %v381_v39 = vshll.u32 %v380_v46, 16 }
 0x4e0   :  { %v398_v51 = vpop.xlane.xlu0 %397 }
 0x4e1   :  { %vm399_vm2 = vcmp.eq.f32.partialorder %v396_v29, %v398_v51  ;;  %v404_v24 = vcvt.f32.s32 %v398_v51 }
 0x4e2   :  { %v400_v16 = vsel %vm399_vm2, %v395_v41, inf }
 0x4e3   :  { %401 = vmin.xlane.f32.xlu2 %v400_v16  ;;  %v405_v37 = vshll.u32 %v404_v24, 16 }
 0x4e5   :  { %v378_v17 = vpop.xlane.xlu1 %377 }
 0x4e6   :  { %v379_v53 = vcvt.f32.s32 %v378_v17 }
 0x4e8   :  { %v382_v38 = vadd.s32 %v381_v39, %v379_v53 }
 0x4ea   :  { %vm383_vm3 = vcmp.eq.s32.totalorder %v729_v36, %v382_v38  ;;  %v459_v38 = vld [vmem:[%s1058_s0] sm:$0x1] }
 0x4eb   :  { %v386_v54 = vsel %vm383_vm3, inf, %v872_v59 }
 0x4ec   :  { %v408_v26 = vsel %vm109_vm5, %v386_v54, inf }
 0x4ed   :  { %409 = vmin.xlane.f32.xlu1 %v408_v26 }
 0x556   :  { %v402_v25 = vpop.xlane.xlu2 %401 }
 0x557   :  { %v403_v50 = vcvt.f32.s32 %v402_v25  ;;  %v611_v25 = vmov 0.0  }
 0x559   :  { %v406_v35 = vadd.s32 %v405_v37, %v403_v50 }
 0x55b   :  { %vm407_vm4 = vcmp.eq.s32.totalorder %v729_v36, %v406_v35 }
 0x55c   :  { %v430_v47 = vsel %vm407_vm4, -inf, %v385_v61 }
 0x55d   :  { %v432_v58 = vsel %vm109_vm5, %v430_v47, -inf }
 0x55e   :  { %433 = vmax.xlane.f32.xlu0 %v432_v58 }
 0x560   :  { %v410_v27 = vpop.xlane.xlu1 %409 }
 0x561   :  { %vm411_vm11 = vcmp.eq.f32.partialorder %v386_v54, %v410_v27  ;;  %v429_v63 = vsel %vm407_vm4, %v410_v27, %v384_v60 }
 0x562   :  { %v412_v7 = vsel %vm411_vm11, %v729_v36, 32 }
 0x563   :  { %v413_v44 = vsel %vm109_vm5, %v412_v7, 2147483647 }
 0x564   :  { %v415_v42 = vshra.s32 %v413_v44, 16  ;;  %v414_v55 = vand.u32 65535, %v413_v44 }
 0x566   :  { %v417_v15 = vcvt.s32.f32 %v415_v42  ;;  %v416_v34 = vcvt.s32.f32 %v414_v55 }
 0x568   :  { %418 = vmin.xlane.f32.xlu2 %v417_v15 }
 0x5d1   :  { %v434_v61 = vpop.xlane.xlu0 %433 }
 0x5d2   :  { %vm435_vm12 = vcmp.eq.f32.partialorder %v430_v47, %v434_v61 }
 0x5d3   :  { %v436_v52 = vsel %vm435_vm12, %v729_v36, 32 }
 0x5d4   :  { %v437_v22 = vsel %vm109_vm5, %v436_v52, 2147483647 }
 0x5d5   :  { %v439_v23 = vshra.s32 %v437_v22, 16  ;;  %v438_v49 = vand.u32 65535, %v437_v22 }
 0x5d7   :  { %v441_v33 = vcvt.s32.f32 %v439_v23  ;;  %v440_v62 = vcvt.s32.f32 %v438_v49 }
 0x5d9   :  { %442 = vmin.xlane.f32.xlu0 %v441_v33 }
 0x5db   :  { %v419_v59 = vpop.xlane.xlu2 %418 }
 0x5dc   :  { %vm420_vm13 = vcmp.eq.f32.partialorder %v417_v15, %v419_v59  ;;  %v425_v3 = vcvt.f32.s32 %v419_v59 }
 0x5dd   :  { %v421_v48 = vsel %vm420_vm13, %v416_v34, inf }
 0x5de   :  { %422 = vmin.xlane.f32.xlu1 %v421_v48  ;;  %v426_v57 = vshll.u32 %v425_v3, 16 }
 0x64c   :  { %v443_v56 = vpop.xlane.xlu0 %442 }
 0x64d   :  { %vm444_vm14 = vcmp.eq.f32.partialorder %v441_v33, %v443_v56  ;;  %v449_v28 = vcvt.f32.s32 %v443_v56 }
 0x64e   :  { %v445_v8 = vsel %vm444_vm14, %v440_v62, inf }
 0x64f   :  { %446 = vmin.xlane.f32.xlu2 %v445_v8  ;;  %v450_v41 = vshll.u32 %v449_v28, 16 }
 0x651   :  { %v423_v45 = vpop.xlane.xlu1 %422 }
 0x652   :  { %v424_v29 = vcvt.f32.s32 %v423_v45 }
 0x654   :  { %v427_v30 = vadd.s32 %v426_v57, %v424_v29 }
 0x656   :  { %vm428_vm15 = vcmp.eq.s32.totalorder %v729_v36, %v427_v30 }
 0x657   :  { %v431_v31 = vsel %vm428_vm15, inf, %v386_v54  ;;  %v460_v54 = vld [vmem:[%s1058_s0 + $0x1] sm:$0x1] }
 0x658   :  { %v453_v32 = vsel %vm109_vm5, %v431_v31, inf }
 0x659   :  { %454 = vmin.xlane.f32.xlu1 %v453_v32 }
 0x6c2   :  { %v447_v40 = vpop.xlane.xlu2 %446 }
 0x6c3   :  { %v448_v51 = vcvt.f32.s32 %v447_v40 }
 0x6c5   :  { %v451_v46 = vadd.s32 %v450_v41, %v448_v51 }
 0x6c7   :  { %vm452_vm0 = vcmp.eq.s32.totalorder %v729_v36, %v451_v46 }
 0x6cc   :  { %v455_v16 = vpop.xlane.xlu1 %454 }
 0x6cd   :  { %v456_v17 = vsel %vm452_vm0, %v455_v16, %v429_v63 }
 0x6ce   :  { %v457_v39 = vmax.f32 %v456_v17, 0.0 }
 0x6d0   :  { %v458_v53 = vmin.f32 %v457_v39, 1.0 }
 0x6d2   :  { %v461_v26 = vsub.f32 1.0, %v458_v53 }
 0x6d4   :  { %v463_v24 = vrot.slane %v461_v26, 1  ;;  %vm465_vm5 = vcmp.lt.f32.partialorder %v459_v38, %v461_v26 }
 0x6d5   :  { %v564_v37 = vsel %vm465_vm5, 1.0, %v611_v25 }
 0x6d6   :  { %vm466_vm7 = vcmp.lt.f32.partialorder %v460_v54, %v463_v24  ;;  %472 = vst.msk [vmem:[%s1059_s3] sm:$0x1] %vm471_vm6, %v564_v37  ;;  %v474_v50 = vperm.slane %v564_v37, 0 }
 0x6d7   :  { %v565_v36 = vsel %vm466_vm7, 1.0, %v611_v25 }
 0x6d8   :  { %473 = vst.msk [vmem:[%s1059_s3 + $0x1] sm:$0x1] %vm471_vm6, %v565_v36  ;;  %v499_v35 = vperm.slane %v565_v36, 0 }
 0x6da   :  { %v591_v47 = vpack.i.bf16 %v499_v35, %v474_v50 }
 0x6dc   :  { %592 = vperm.xlu1 %590, %v591_v47   ;;  %586 = vperm.xlu2 %584, %v591_v47  }
 0x6dd   :  { %580 = vperm.xlu0 %578, %v591_v47  }
 0x6e4   :  { %596 = vset.pattern.permute.xlu2 %v846_v43 }
 0x6e5   :  { %602 = vset.pattern.permute.xlu0 %v846_v43 }
 0x6ec   :  { %598 = vperm.xlu2 %596, %v591_v47  }
 0x736   :  { %v587_v58 = vpop.permute.xlu2 %586 }
 0x737   :  { %v589_v60 = vunpack.i.h.bf16 %v587_v58  ;;  %v588_v27 = vunpack.i.l.bf16 %v587_v58 }
 0x739   :  { %v534_v63 = vmul.f32 %v589_v60, %v671_v9  ;;  %v535_v7 = vmul.f32 %v589_v60, %v676_v10  ;;  %v526_v44 = vmul.f32 %v588_v27, %v681_v11  ;;  %v527_v42 = vmul.f32 %v588_v27, %v686_v12 }
 0x73b   :  { %550 = vst [vmem:[%s1060_s2 + $0x50] sm:$0xff] %v534_v63 }
 0x73c   :  { %551 = vst [vmem:[%s1060_s2 + $0x58] sm:$0xff] %v535_v7 }
 0x73d   :  { %542 = vst [vmem:[%s1060_s2 + $0x10] sm:$0xff] %v526_v44 }
 0x73e   :  { %543 = vst [vmem:[%s1060_s2 + $0x18] sm:$0xff] %v527_v42 }
 0x746   :  { %v599_v9 = vpop.permute.xlu2 %598 }
 0x747   :  { %v601_v10 = vunpack.i.h.bf16 %v599_v9  ;;  %v600_v11 = vunpack.i.l.bf16 %v599_v9 }
 0x749   :  { %v538_v12 = vmul.f32 %v601_v10, %v707_v18  ;;  %v539_v43 = vmul.f32 %v601_v10, %v712_v19  ;;  %v530_v15 = vmul.f32 %v600_v11, %v717_v20  ;;  %v531_v61 = vmul.f32 %v600_v11, %v722_v21 }
 0x74b   :  { %554 = vst [vmem:[%s1060_s2 + $0x70] sm:$0xff] %v538_v12 }
 0x74c   :  { %555 = vst [vmem:[%s1060_s2 + $0x78] sm:$0xff] %v539_v43 }
 0x74d   :  { %546 = vst [vmem:[%s1060_s2 + $0x30] sm:$0xff] %v530_v15 }
 0x74e   :  { %547 = vst [vmem:[%s1060_s2 + $0x38] sm:$0xff] %v531_v61  ;;  %v593_v18 = vpop.permute.xlu1 %592 }
 0x74f   :  { %v595_v19 = vunpack.i.h.bf16 %v593_v18  ;;  %v594_v20 = vunpack.i.l.bf16 %v593_v18  ;;  %v581_v21 = vpop.permute.xlu0 %580 }
 0x750   :  { %v583_v52 = vunpack.i.h.bf16 %v581_v21  ;;  %v582_v55 = vunpack.i.l.bf16 %v581_v21 }
 0x751   :  { %v536_v22 = vmul.f32 %v595_v19, %v691_v13  ;;  %v537_v23 = vmul.f32 %v595_v19, %v696_v14  ;;  %v528_v33 = vmul.f32 %v594_v20, %v657_v5  ;;  %v529_v59 = vmul.f32 %v594_v20, %v662_v6 }
 0x752   :  { %v532_v34 = vmul.f32 %v583_v52, %v635_v0  ;;  %v533_v48 = vmul.f32 %v583_v52, %v640_v1  ;;  %v524_v5 = vmul.f32 %v582_v55, %v645_v2  ;;  %v525_v6 = vmul.f32 %v582_v55, %v652_v4 }
 0x753   :  { %552 = vst [vmem:[%s1060_s2 + $0x60] sm:$0xff] %v536_v22 }
 0x754   :  { %553 = vst [vmem:[%s1060_s2 + $0x68] sm:$0xff] %v537_v23 }
 0x755   :  { %544 = vst [vmem:[%s1060_s2 + $0x20] sm:$0xff] %v528_v33 }
 0x756   :  { %545 = vst [vmem:[%s1060_s2 + $0x28] sm:$0xff] %v529_v59 }
 0x757   :  { %548 = vst [vmem:[%s1060_s2 + $0x40] sm:$0xff] %v532_v34 }
 0x758   :  { %549 = vst [vmem:[%s1060_s2 + $0x48] sm:$0xff] %v533_v48 }
 0x759   :  { %540 = vst [vmem:[%s1060_s2] sm:$0xff] %v524_v5 }
 0x75a   :  { %541 = vst [vmem:[%s1060_s2 + $0x8] sm:$0xff] %v525_v6 }

</bundles_post_ra>
